<compile_context>
chip_gen: v7x
topology: tpu7x:2x2x1
jax: 0.10.0
libtpu: 0.0.40
codegen_flags: <defaults>
</compile_context>

<pallas_src>
import jax
import jax.numpy as jnp
from jax.experimental import pallas as pl
from jax.experimental.pallas import tpu as pltpu

# ---- module hyperparameters (from the PyTorch script) ----------------------
SENTENCE = 'kedi koltuğun üzerine zıpladı'
WORD_LIST = sorted(list(set(SENTENCE.split(' '))))
VOCAB_SIZE = len(WORD_LIST)          # 4
EMBEDDING_DIM = 10
HIDDEN_SIZE = 12

# ---- padded-layout constants ------------------------------------------------
_LANE = 128          # H and V are zero-padded to 128 lanes
_SUB = 8             # batch is zero-padded to a multiple of 8 sublanes


def _round_up(n, m):
    return ((n + m - 1) // m) * m


# ---- Pallas kernel: serial tanh recurrence + hoisted fc projection ----------
def word_rnn_kernel(u_ref, h0_ref, w_ref, bfc_ref, out_ref, hn_ref):
    """
    u_ref  : (S*Bp, 128) f32   pre-composed input projection per (t, b) row
                               (= emb[token] @ W_ih^T + b_ih + b_hh), time-major.
    h0_ref : (Bp, 128)   f32   initial hidden state (H zero-padded).
    w_ref  : (256, 128)  bf16  packed {W_hh^T rows 0:128, W_fc^T rows 128:256};
                               zero padding is load-bearing (padded lanes stay 0).
    bfc_ref: (1, 128)    f32   fc bias (V zero-padded).
    out_ref: (S*Bp, 128) f32   logits slab (lane-dense); rows are also reused
                               as the hidden-state stash during the recurrence.
    hn_ref : (Bp, 128)   f32   final hidden state.
    """
    n_rows = u_ref.shape[0]
    bp = h0_ref.shape[0]
    seq_len = n_rows // bp           # static Python int

    w_hh = w_ref[0:_LANE, :]         # bf16, loop-invariant
    w_fc = w_ref[_LANE:2 * _LANE, :]

    u = u_ref[...]                   # (S*Bp, 128) f32, kept in vregs
    h = h0_ref[...]                  # (Bp, 128) f32

    # Serial recurrence: only the bf16 MXU dot + f32 add + f32 tanh sit on the
    # dependence chain.  Fully unrolled (S is tiny and static).
    # TODO(synk): if S grows, switch to lax.fori_loop(..., unroll=8) and/or
    # explicit MXU weight staging (pltpu.matmul_push_rhs) for W_hh.
    for t in range(seq_len):
        z = u[t * bp:(t + 1) * bp, :] + jnp.dot(
            h.astype(jnp.bfloat16), w_hh, preferred_element_type=jnp.float32)
        h = jnp.tanh(z)
        out_ref[t * bp:(t + 1) * bp, :] = h      # stash (off the serial chain)
    hn_ref[...] = h

    # Hoisted output projection for ALL timesteps: one batched bf16 GEMM with
    # the fc bias added once; single lane-dense (S*Bp, 128) store.
    hs = out_ref[...]
    out_ref[...] = (
        jnp.dot(hs.astype(jnp.bfloat16), w_fc, preferred_element_type=jnp.float32)
        + bfc_ref[...])


# ---- one-time parameter packing (outside the per-call path) -----------------
def pack_params(params):
    """Pre-compose embedding with W_ih and pack bf16 MXU weight slab. Call once."""
    emb_table, w_ih, w_hh, b_ih, b_hh, w_fc, b_fc = (
        jnp.asarray(p, jnp.float32) for p in params)
    V = emb_table.shape[0]
    H = w_hh.shape[0]
    Vout = w_fc.shape[0]
    assert max(H, Vout, emb_table.shape[1]) <= _LANE, "assumes E, H, V <= 128"

    # u[t, b] = emb[token] @ W_ih^T + b_ih + b_hh  ==  table[token]
    table = emb_table @ w_ih.T + (b_ih + b_hh)                        # (V, H)
    t_pad = jnp.zeros((V, _LANE), jnp.float32).at[:, :H].set(table)

    # bf16 MXU-operand slab; zero padding keeps padded lanes of h/out exactly 0.
    w_hh_p = jnp.zeros((_LANE, _LANE), jnp.float32).at[:H, :H].set(w_hh.T)
    w_fc_p = jnp.zeros((_LANE, _LANE), jnp.float32).at[:H, :Vout].set(w_fc.T)
    w_slab = jnp.concatenate([w_hh_p, w_fc_p], axis=0).astype(jnp.bfloat16)

    b_fc_pad = jnp.zeros((1, _LANE), jnp.float32).at[0, :Vout].set(b_fc)
    return (t_pad, w_slab, b_fc_pad)


# ---- jitted forward path -----------------------------------------------------
@jax.jit
def _forward_impl(tokens, packed, hidden_state):
    t_pad, w_slab, b_fc_pad = packed
    B, S = tokens.shape
    H = hidden_state.shape[-1]
    Bp = _round_up(max(B, 1), _SUB)

    # Tiny gather replaces the old embedded-input slab + in-kernel GEMM.
    tok_tm = jnp.zeros((S, Bp), jnp.int32).at[:, :B].set(tokens.T)    # time-major
    u_slab = jnp.take(t_pad, tok_tm.reshape(-1), axis=0)              # (S*Bp, 128)

    h0 = hidden_state.reshape(B, H)
    h0_slab = jnp.zeros((Bp, _LANE), jnp.float32).at[:B, :H].set(h0)

    vmem = pl.BlockSpec(memory_space=pltpu.MemorySpace.VMEM)
    out_slab, hn_slab = pl.pallas_call(
        word_rnn_kernel,
        out_shape=(jax.ShapeDtypeStruct((S * Bp, _LANE), jnp.float32),
                   jax.ShapeDtypeStruct((Bp, _LANE), jnp.float32)),
        in_specs=[vmem, vmem, vmem, vmem],
        out_specs=(vmem, vmem),
    )(u_slab, h0_slab, w_slab, b_fc_pad)

    # Un-pad back to the PyTorch (batch_first) layout.
    outputs = jnp.transpose(
        out_slab.reshape(S, Bp, _LANE)[:, :B, :VOCAB_SIZE], (1, 0, 2))  # (B,S,V)
    hidden = hn_slab[:B, :H][None]                                      # (1,B,H)
    return outputs, hidden


def word_rnn_forward(tokens, packed, hidden_state=None):
    """tokens: (B, S) int32 word ids.  Returns (logits (B,S,V), hidden (1,B,H))."""
    B, _ = tokens.shape
    if hidden_state is None:
        hidden_state = jnp.zeros((1, B, HIDDEN_SIZE), jnp.float32)
    return _forward_impl(tokens, packed, hidden_state.astype(jnp.float32))


# ---- pure-JAX reference for sanity check ------------------------------------
def word_rnn_reference(tokens, params, hidden_state=None):
    emb_table, w_ih, w_hh, b_ih, b_hh, w_fc, b_fc = params
    B, S = tokens.shape
    H = w_hh.shape[0]
    x = jnp.take(emb_table, tokens, axis=0)                # (B, S, E)
    h = jnp.zeros((B, H), jnp.float32) if hidden_state is None \
        else jnp.reshape(hidden_state, (B, H)).astype(jnp.float32)
    outs = []
    for t in range(S):
        h = jnp.tanh(x[:, t] @ w_ih.T + b_ih + h @ w_hh.T + b_hh)
        outs.append(h @ w_fc.T + b_fc)
    return jnp.stack(outs, axis=1), h[None]


# ---- deterministic parameter init -------------------------------------------
def init_params(key, vocab_size, embedding_dim, hidden_size):
    ks = jax.random.split(key, 7)
    scale = 0.1
    emb_table = scale * jax.random.normal(ks[0], (vocab_size, embedding_dim), jnp.float32)
    w_ih = scale * jax.random.normal(ks[1], (hidden_size, embedding_dim), jnp.float32)
    w_hh = scale * jax.random.normal(ks[2], (hidden_size, hidden_size), jnp.float32)
    b_ih = scale * jax.random.normal(ks[3], (hidden_size,), jnp.float32)
    b_hh = scale * jax.random.normal(ks[4], (hidden_size,), jnp.float32)
    w_fc = scale * jax.random.normal(ks[5], (vocab_size, hidden_size), jnp.float32)
    b_fc = scale * jax.random.normal(ks[6], (vocab_size,), jnp.float32)
    return (emb_table, w_ih, w_hh, b_ih, b_hh, w_fc, b_fc)


if __name__ == "__main__":
    root = jax.random.PRNGKey(0)
    k_params, k_tokens = jax.random.split(root)
    params = init_params(k_params, VOCAB_SIZE, EMBEDDING_DIM, HIDDEN_SIZE)
    packed = pack_params(params)          # packed once, reused across calls
    jax.block_until_ready(packed)

    # batch=2, seq=4 (length of the sentence), word ids in [0, VOCAB_SIZE)
    B, S = 2, 4
    tokens = jax.random.randint(k_tokens, (B, S), 0, VOCAB_SIZE, dtype=jnp.int32)

    outputs, hidden = word_rnn_forward(tokens, packed)
    jax.block_until_ready((outputs, hidden))

    ref_out, ref_hid = word_rnn_reference(tokens, params)
    assert outputs.shape == (B, S, VOCAB_SIZE)
    assert hidden.shape == (1, B, HIDDEN_SIZE)
    # bf16 MXU operands => ~1e-3-level deviation from the f32 reference; values
    # are O(0.2), so 1e-2 tolerance still catches any structural/semantics bug.
    assert jnp.allclose(outputs, ref_out, atol=1e-2, rtol=1e-2)
    assert jnp.allclose(hidden, ref_hid, atol=1e-2, rtol=1e-2)

    # Stateful second step: feed the same hidden state to kernel and reference.
    outputs2, hidden2 = word_rnn_forward(tokens, packed, hidden)
    jax.block_until_ready((outputs2, hidden2))
    ref_out2, ref_hid2 = word_rnn_reference(tokens, params, hidden)
    assert jnp.allclose(outputs2, ref_out2, atol=1e-2, rtol=1e-2)
    assert jnp.allclose(hidden2, ref_hid2, atol=1e-2, rtol=1e-2)

    print("KERNEL_OK")
</pallas_src>

<mosaic_0001>
module attributes {stable_mosaic.version = 11 : i64} {
  func.func @word_rnn_kernel(%arg0: memref<32x128xf32, #tpu.memory_space<vmem>>, %arg1: memref<8x128xf32, #tpu.memory_space<vmem>>, %arg2: memref<256x128xbf16, #tpu.memory_space<vmem>>, %arg3: memref<1x128xf32, #tpu.memory_space<vmem>>, %arg4: memref<32x128xf32, #tpu.memory_space<vmem>>, %arg5: memref<8x128xf32, #tpu.memory_space<vmem>>) attributes {dimension_semantics = [], scalar_prefetch = 0 : i64, scratch_operands = 0 : i64, tpu.core_type = #tpu.core_type<tc>} {
    %c0 = arith.constant 0 : index
    %c0_0 = arith.constant 0 : index
    %0 = vector.load %arg2[%c0, %c0_0] : memref<256x128xbf16, #tpu.memory_space<vmem>>, vector<128x128xbf16>
    %c128 = arith.constant 128 : index
    %c0_1 = arith.constant 0 : index
    %1 = vector.load %arg2[%c128, %c0_1] : memref<256x128xbf16, #tpu.memory_space<vmem>>, vector<128x128xbf16>
    %c0_2 = arith.constant 0 : index
    %c0_3 = arith.constant 0 : index
    %2 = vector.load %arg0[%c0_2, %c0_3] : memref<32x128xf32, #tpu.memory_space<vmem>>, vector<32x128xf32>
    %c0_4 = arith.constant 0 : index
    %c0_5 = arith.constant 0 : index
    %3 = vector.load %arg1[%c0_4, %c0_5] : memref<8x128xf32, #tpu.memory_space<vmem>>, vector<8x128xf32>
    %4 = vector.extract_strided_slice %2 {offsets = [0, 0], sizes = [8, 128], strides = [1, 1]} : vector<32x128xf32> to vector<8x128xf32>
    %5 = arith.truncf %3 : vector<8x128xf32> to vector<8x128xbf16>
    %cst = arith.constant dense<0.000000e+00> : vector<8x128xf32>
    %6 = tpu.matmul %5, %0, %cst {dimension_numbers = #tpu.dot_dimension_numbers<[1], [0], [0], [1], [0, 0, 1, 1], [], []>} : vector<8x128xbf16>, vector<128x128xbf16>, vector<8x128xf32> -> vector<8x128xf32>
    %7 = arith.addf %4, %6 : vector<8x128xf32>
    %8 = math.tanh %7 : vector<8x128xf32>
    %c0_6 = arith.constant 0 : index
    %c0_7 = arith.constant 0 : index
    %9 = vector.load %arg4[%c0_6, %c0_7] : memref<32x128xf32, #tpu.memory_space<vmem>>, vector<8x128xf32>
    tpu.vector_store %arg4[%c0_6, %c0_7], %8 {strides = array<i32>} : memref<32x128xf32, #tpu.memory_space<vmem>>, vector<8x128xf32>,
    %10 = vector.extract_strided_slice %2 {offsets = [8, 0], sizes = [8, 128], strides = [1, 1]} : vector<32x128xf32> to vector<8x128xf32>
    %11 = arith.truncf %8 : vector<8x128xf32> to vector<8x128xbf16>
    %cst_8 = arith.constant dense<0.000000e+00> : vector<8x128xf32>
    %12 = tpu.matmul %11, %0, %cst_8 {dimension_numbers = #tpu.dot_dimension_numbers<[1], [0], [0], [1], [0, 0, 1, 1], [], []>} : vector<8x128xbf16>, vector<128x128xbf16>, vector<8x128xf32> -> vector<8x128xf32>
    %13 = arith.addf %10, %12 : vector<8x128xf32>
    %14 = math.tanh %13 : vector<8x128xf32>
    %c8 = arith.constant 8 : index
    %c0_9 = arith.constant 0 : index
    %15 = vector.load %arg4[%c8, %c0_9] : memref<32x128xf32, #tpu.memory_space<vmem>>, vector<8x128xf32>
    tpu.vector_store %arg4[%c8, %c0_9], %14 {strides = array<i32>} : memref<32x128xf32, #tpu.memory_space<vmem>>, vector<8x128xf32>,
    %16 = vector.extract_strided_slice %2 {offsets = [16, 0], sizes = [8, 128], strides = [1, 1]} : vector<32x128xf32> to vector<8x128xf32>
    %17 = arith.truncf %14 : vector<8x128xf32> to vector<8x128xbf16>
    %cst_10 = arith.constant dense<0.000000e+00> : vector<8x128xf32>
    %18 = tpu.matmul %17, %0, %cst_10 {dimension_numbers = #tpu.dot_dimension_numbers<[1], [0], [0], [1], [0, 0, 1, 1], [], []>} : vector<8x128xbf16>, vector<128x128xbf16>, vector<8x128xf32> -> vector<8x128xf32>
    %19 = arith.addf %16, %18 : vector<8x128xf32>
    %20 = math.tanh %19 : vector<8x128xf32>
    %c16 = arith.constant 16 : index
    %c0_11 = arith.constant 0 : index
    %21 = vector.load %arg4[%c16, %c0_11] : memref<32x128xf32, #tpu.memory_space<vmem>>, vector<8x128xf32>
    tpu.vector_store %arg4[%c16, %c0_11], %20 {strides = array<i32>} : memref<32x128xf32, #tpu.memory_space<vmem>>, vector<8x128xf32>,
    %22 = vector.extract_strided_slice %2 {offsets = [24, 0], sizes = [8, 128], strides = [1, 1]} : vector<32x128xf32> to vector<8x128xf32>
    %23 = arith.truncf %20 : vector<8x128xf32> to vector<8x128xbf16>
    %cst_12 = arith.constant dense<0.000000e+00> : vector<8x128xf32>
    %24 = tpu.matmul %23, %0, %cst_12 {dimension_numbers = #tpu.dot_dimension_numbers<[1], [0], [0], [1], [0, 0, 1, 1], [], []>} : vector<8x128xbf16>, vector<128x128xbf16>, vector<8x128xf32> -> vector<8x128xf32>
    %25 = arith.addf %22, %24 : vector<8x128xf32>
    %26 = math.tanh %25 : vector<8x128xf32>
    %c24 = arith.constant 24 : index
    %c0_13 = arith.constant 0 : index
    %27 = vector.load %arg4[%c24, %c0_13] : memref<32x128xf32, #tpu.memory_space<vmem>>, vector<8x128xf32>
    tpu.vector_store %arg4[%c24, %c0_13], %26 {strides = array<i32>} : memref<32x128xf32, #tpu.memory_space<vmem>>, vector<8x128xf32>,
    %c0_14 = arith.constant 0 : index
    %c0_15 = arith.constant 0 : index
    %28 = vector.load %arg5[%c0_14, %c0_15] : memref<8x128xf32, #tpu.memory_space<vmem>>, vector<8x128xf32>
    tpu.vector_store %arg5[%c0_14, %c0_15], %26 {strides = array<i32>} : memref<8x128xf32, #tpu.memory_space<vmem>>, vector<8x128xf32>,
    %c0_16 = arith.constant 0 : index
    %c0_17 = arith.constant 0 : index
    %29 = vector.load %arg4[%c0_16, %c0_17] : memref<32x128xf32, #tpu.memory_space<vmem>>, vector<32x128xf32>
    %30 = arith.truncf %29 : vector<32x128xf32> to vector<32x128xbf16>
    %cst_18 = arith.constant dense<0.000000e+00> : vector<32x128xf32>
    %31 = tpu.matmul %30, %1, %cst_18 {dimension_numbers = #tpu.dot_dimension_numbers<[1], [0], [0], [1], [0, 0, 1, 1], [], []>} : vector<32x128xbf16>, vector<128x128xbf16>, vector<32x128xf32> -> vector<32x128xf32>
    %c0_19 = arith.constant 0 : index
    %c0_20 = arith.constant 0 : index
    %32 = vector.load %arg3[%c0_19, %c0_20] : memref<1x128xf32, #tpu.memory_space<vmem>>, vector<1x128xf32>
    %33 = vector.broadcast %32 : vector<1x128xf32> to vector<32x128xf32>
    %34 = arith.addf %31, %33 : vector<32x128xf32>
    %c0_21 = arith.constant 0 : index
    %c0_22 = arith.constant 0 : index
    %35 = vector.load %arg4[%c0_21, %c0_22] : memref<32x128xf32, #tpu.memory_space<vmem>>, vector<32x128xf32>
    tpu.vector_store %arg4[%c0_21, %c0_22], %34 {strides = array<i32>} : memref<32x128xf32, #tpu.memory_space<vmem>>, vector<32x128xf32>,
    return
  }
}

</mosaic_0001>

<bundles_post_ra>
// kernel: _forward_impl.1
= control target key start
LH: loop header
LB: loop body
LE: loop exit
PB: predicated region body
PF: predicated region fallthrough
CT: control target
= control target key end

     0   :  { %v593_v0 = vmov 0.0   ;;  %vm594_vm0 = vmmov 0   ;;  %s770_s2 = inlined_call_operand.vmem [shape: bf16[256,128], index: 2, kind: input, shape index: {}]   ;;  %s771_s1 = inlined_call_operand.vmem [shape: f32[8,128], index: 1, kind: input, shape index: {}]   ;;  %s772_s0 = inlined_call_operand.vmem [shape: f32[32,128], index: 0, kind: input, shape index: {}]   ;;  %s773_s5 = inlined_call_operand.vmem [shape: f32[8,128], index: 5, kind: output, shape index: {1}]   ;;  %s774_s3 = inlined_call_operand.vmem [shape: f32[1,128], index: 3, kind: input, shape index: {}]   ;;  %s775_s4 = inlined_call_operand.vmem [shape: f32[32,128], index: 4, kind: output, shape index: {0}]  }
   0x1   :  { %467 = vmatprep.subr.bf16.mxu0 %v593_v0  ;;  %v629_v1 = vld [vmem:[%s770_s2] sm:$0xff]   ;;  %483 = vmatprep.mubr.msk.bf16.mxu0 %vm594_vm0, %v593_v0  ;;  %v640_v2 = vld [vmem:[%s770_s2 + $0x8] sm:$0xff]   ;;  %v649_v3 = vld [vmem:[%s770_s2 + $0x10] sm:$0xff]  }
   0x2   :  { %487 = vmatprep.subr.bf16.mxu1 %v593_v0  ;;  %503 = vmatprep.mubr.msk.bf16.mxu1 %vm594_vm0, %v593_v0  ;;  %v657_v4 = vld [vmem:[%s770_s2 + $0x18] sm:$0xff]   ;;  %v573_v5 = vld [vmem:[%s770_s2 + $0x20] sm:$0xff]   ;;  %v574_v6 = vld [vmem:[%s770_s2 + $0x28] sm:$0xff]  }
   0x3   :  { %468 = vmatpush3.bf16.msra.mxu0 %v629_v1  ;;  %488 = vmatpush3.bf16.msra.mxu1 %v629_v1  ;;  %v575_v7 = vld [vmem:[%s770_s2 + $0x30] sm:$0xff]   ;;  %v576_v8 = vld [vmem:[%s770_s2 + $0x38] sm:$0xff]   ;;  %v56_v9 = vld [vmem:[%s771_s1] sm:$0xff] }
   0x4   :  { %469 = vmatprep.subr.bf16.mxu0 %v593_v0  ;;  %489 = vmatprep.subr.bf16.mxu1 %v593_v0  ;;  %v57_v10 = vpack.c.bf16 %v56_v9, %v56_v9  ;;  %v52_v11 = vld [vmem:[%s772_s0] sm:$0xff]  ;;  %v53_v19 = vld [vmem:[%s772_s0 + $0x8] sm:$0xff]  ;;  %v54_v30 = vld [vmem:[%s772_s0 + $0x10] sm:$0xff] }
   0x5   :  { %v577_v28 = vld [vmem:[%s770_s2 + $0x40] sm:$0xff]   ;;  %v578_v29 = vld [vmem:[%s770_s2 + $0x48] sm:$0xff]   ;;  %v579_v38 = vld [vmem:[%s770_s2 + $0x50] sm:$0xff]  }
   0x6   :  { %v580_v39 = vld [vmem:[%s770_s2 + $0x58] sm:$0xff]   ;;  %v581_v40 = vld [vmem:[%s770_s2 + $0x60] sm:$0xff]   ;;  %v582_v41 = vld [vmem:[%s770_s2 + $0x68] sm:$0xff]  }
   0x7   :  { %470 = vmatpush3.bf16.msra.mxu0 %v640_v2  ;;  %490 = vmatpush3.bf16.msra.mxu1 %v640_v2  ;;  %v583_v42 = vld [vmem:[%s770_s2 + $0x70] sm:$0xff]   ;;  %v584_v43 = vld [vmem:[%s770_s2 + $0x78] sm:$0xff]   ;;  %v412_v52 = vld [vmem:[%s774_s3] ss:$0 sm:$0xff] }
   0x8   :  { %471 = vmatprep.subr.bf16.mxu0 %v593_v0  ;;  %491 = vmatprep.subr.bf16.mxu1 %v593_v0  ;;  %v55_v44 = vld [vmem:[%s772_s0 + $0x18] sm:$0xff] }
   0xb   :  { %472 = vmatpush3.bf16.msra.mxu0 %v649_v3  ;;  %492 = vmatpush3.bf16.msra.mxu1 %v649_v3 }
   0xc   :  { %473 = vmatprep.subr.bf16.mxu0 %v593_v0  ;;  %493 = vmatprep.subr.bf16.mxu1 %v593_v0 }
   0xf   :  { %474 = vmatpush3.bf16.msra.mxu0 %v657_v4  ;;  %494 = vmatpush3.bf16.msra.mxu1 %v657_v4 }
  0x10   :  { %475 = vmatprep.subr.bf16.mxu0 %v593_v0  ;;  %495 = vmatprep.subr.bf16.mxu1 %v593_v0 }
  0x13   :  { %476 = vmatpush3.bf16.msra.mxu0 %v573_v5  ;;  %496 = vmatpush3.bf16.msra.mxu1 %v573_v5 }
  0x14   :  { %477 = vmatprep.subr.bf16.mxu0 %v593_v0  ;;  %497 = vmatprep.subr.bf16.mxu1 %v593_v0 }
  0x17   :  { %478 = vmatpush3.bf16.msra.mxu0 %v574_v6  ;;  %498 = vmatpush3.bf16.msra.mxu1 %v574_v6 }
  0x18   :  { %479 = vmatprep.subr.bf16.mxu0 %v593_v0  ;;  %499 = vmatprep.subr.bf16.mxu1 %v593_v0 }
  0x1b   :  { %480 = vmatpush3.bf16.msra.mxu0 %v575_v7  ;;  %500 = vmatpush3.bf16.msra.mxu1 %v575_v7 }
  0x1c   :  { %481 = vmatprep.subr.bf16.mxu0 %v593_v0  ;;  %501 = vmatprep.subr.bf16.mxu1 %v593_v0 }
  0x1f   :  { %482 = vmatpush3.bf16.msra.mxu0 %v576_v8  ;;  %502 = vmatpush3.bf16.msra.mxu1 %v576_v8 }
  0x20   :  { %507 = vmatprep.subr.bf16.mxu0 %v593_v0  ;;  %527 = vmatprep.subr.bf16.mxu1 %v593_v0 }
  0x22   :  { %484 = vmatmul.mubr.bf16.vlgmr.msra.gmra.mrb[0].mxu0 %v57_v10 }
  0x23   :  { %508 = vmatpush3.bf16.msra.mxu0 %v629_v1  ;;  %523 = vmatprep.mubr.msk.bf16.mxu0 %vm594_vm0, %v593_v0 }
  0x24   :  { %509 = vmatprep.subr.bf16.mxu0 %v593_v0 }
  0x27   :  { %510 = vmatpush3.bf16.msra.mxu0 %v640_v2 }
  0x28   :  { %511 = vmatprep.subr.bf16.mxu0 %v593_v0 }
  0x2b   :  { %512 = vmatpush3.bf16.msra.mxu0 %v649_v3 }
  0x2c   :  { %513 = vmatprep.subr.bf16.mxu0 %v593_v0 }
  0x2f   :  { %514 = vmatpush3.bf16.msra.mxu0 %v657_v4 }
  0x30   :  { %515 = vmatprep.subr.bf16.mxu0 %v593_v0 }
  0x33   :  { %516 = vmatpush3.bf16.msra.mxu0 %v573_v5 }
  0x34   :  { %517 = vmatprep.subr.bf16.mxu0 %v593_v0 }
  0x37   :  { %518 = vmatpush3.bf16.msra.mxu0 %v574_v6 }
  0x38   :  { %519 = vmatprep.subr.bf16.mxu0 %v593_v0 }
  0x3b   :  { %520 = vmatpush3.bf16.msra.mxu0 %v575_v7 }
  0x3c   :  { %521 = vmatprep.subr.bf16.mxu0 %v593_v0 }
  0x3f   :  { %522 = vmatpush3.bf16.msra.mxu0 %v576_v8 }
  0x40   :  { %547 = vmatprep.subr.bf16.mxu0 %v577_v28 }
  0xf5   :  { %v140_v12 = vpop.f32.mrb[0].mxu0 }
  0xf6   :  { %v146_v13 = vadd.f32 %v140_v12, %v52_v11  ;;  %v485_v14 = vpop.f32.mrb[1].mxu0 }
  0xf7   :  { %v143_v15 = vpop.f32.mrb[2].mxu0 }
  0xf8   :  { %585 = vtanh.f32 %v146_v13  ;;  %v486_v16 = vpop.f32.mrb[3].mxu0 }
 0x102   :  { %v586_v17 = vpop.eup %585 }
 0x103   :  { %v149_v18 = vpack.c.bf16 %v586_v17, %v586_v17 }
 0x105   :  { %504 = vmatmul.mubr.bf16.vlgmr.msra.gmra.mrb[0].mxu1 %v149_v18 }
 0x106   :  { %528 = vmatpush3.bf16.msra.mxu1 %v629_v1  ;;  %543 = vmatprep.mubr.msk.bf16.mxu1 %vm594_vm0, %v593_v0 }
 0x107   :  { %529 = vmatprep.subr.bf16.mxu1 %v593_v0 }
 0x10a   :  { %530 = vmatpush3.bf16.msra.mxu1 %v640_v2 }
 0x10b   :  { %531 = vmatprep.subr.bf16.mxu1 %v593_v0 }
 0x10e   :  { %532 = vmatpush3.bf16.msra.mxu1 %v649_v3 }
 0x10f   :  { %533 = vmatprep.subr.bf16.mxu1 %v593_v0 }
 0x112   :  { %534 = vmatpush3.bf16.msra.mxu1 %v657_v4 }
 0x113   :  { %535 = vmatprep.subr.bf16.mxu1 %v593_v0 }
 0x116   :  { %536 = vmatpush3.bf16.msra.mxu1 %v573_v5 }
 0x117   :  { %537 = vmatprep.subr.bf16.mxu1 %v593_v0 }
 0x11a   :  { %538 = vmatpush3.bf16.msra.mxu1 %v574_v6 }
 0x11b   :  { %539 = vmatprep.subr.bf16.mxu1 %v593_v0 }
 0x11e   :  { %540 = vmatpush3.bf16.msra.mxu1 %v575_v7 }
 0x11f   :  { %541 = vmatprep.subr.bf16.mxu1 %v593_v0 }
 0x122   :  { %542 = vmatpush3.bf16.msra.mxu1 %v576_v8 }
 0x1d8   :  { %v184_v20 = vpop.f32.mrb[0].mxu1 }
 0x1d9   :  { %v190_v21 = vadd.f32 %v184_v20, %v53_v19  ;;  %v505_v22 = vpop.f32.mrb[1].mxu1 }
 0x1da   :  { %v187_v23 = vpop.f32.mrb[2].mxu1 }
 0x1db   :  { %587 = vtanh.f32 %v190_v21  ;;  %v506_v24 = vpop.f32.mrb[3].mxu1 }
 0x1e5   :  { %v588_v25 = vpop.eup %587 }
 0x1e6   :  { %v193_v26 = vpack.c.bf16 %v588_v25, %v588_v25  ;;  %v286_v27 = vpack.c.bf16 %v588_v25, %v586_v17 }
 0x1e8   :  { %524 = vmatmul.mubr.bf16.vlgmr.msra.gmra.mrb[4].mxu0 %v193_v26 }
 0x1e9   :  { %563 = vmatprep.mubr.bf16.mxu0 %v286_v27  ;;  %548 = vmatpush3.bf16.msra.mxu0 %v577_v28 }
 0x1ea   :  { %549 = vmatprep.subr.bf16.mxu0 %v578_v29 }
 0x1ed   :  { %550 = vmatpush3.bf16.msra.mxu0 %v578_v29 }
 0x1ee   :  { %551 = vmatprep.subr.bf16.mxu0 %v579_v38 }
 0x1f1   :  { %552 = vmatpush3.bf16.msra.mxu0 %v579_v38 }
 0x1f2   :  { %553 = vmatprep.subr.bf16.mxu0 %v580_v39 }
 0x1f5   :  { %554 = vmatpush3.bf16.msra.mxu0 %v580_v39 }
 0x1f6   :  { %555 = vmatprep.subr.bf16.mxu0 %v581_v40 }
 0x1f9   :  { %556 = vmatpush3.bf16.msra.mxu0 %v581_v40 }
 0x1fa   :  { %557 = vmatprep.subr.bf16.mxu0 %v582_v41 }
 0x1fd   :  { %558 = vmatpush3.bf16.msra.mxu0 %v582_v41 }
 0x1fe   :  { %559 = vmatprep.subr.bf16.mxu0 %v583_v42 }
 0x201   :  { %560 = vmatpush3.bf16.msra.mxu0 %v583_v42 }
 0x202   :  { %561 = vmatprep.subr.bf16.mxu0 %v584_v43 }
 0x205   :  { %562 = vmatpush3.bf16.msra.mxu0 %v584_v43 }
 0x2bb   :  { %v228_v31 = vpop.f32.mrb[4].mxu0 }
 0x2bc   :  { %v234_v32 = vadd.f32 %v228_v31, %v54_v30  ;;  %v525_v33 = vpop.f32.mrb[5].mxu0 }
 0x2bd   :  { %v231_v34 = vpop.f32.mrb[6].mxu0 }
 0x2be   :  { %589 = vtanh.f32 %v234_v32  ;;  %v526_v35 = vpop.f32.mrb[7].mxu0 }
 0x2c8   :  { %v590_v36 = vpop.eup %589 }
 0x2c9   :  { %v237_v37 = vpack.c.bf16 %v590_v36, %v590_v36 }
 0x2cb   :  { %544 = vmatmul.mubr.bf16.vlgmr.msra.gmra.mrb[4].mxu1 %v237_v37 }
 0x39e   :  { %v272_v45 = vpop.f32.mrb[4].mxu1 }
 0x39f   :  { %v278_v46 = vadd.f32 %v272_v45, %v55_v44  ;;  %v545_v47 = vpop.f32.mrb[5].mxu1 }
 0x3a0   :  { %v275_v48 = vpop.f32.mrb[6].mxu1 }
 0x3a1   :  { %591 = vtanh.f32 %v278_v46  ;;  %v546_v49 = vpop.f32.mrb[7].mxu1 }
 0x3ab   :  { %v592_v50 = vpop.eup %591 }
 0x3ac   :  { %281 = vst [vmem:[%s773_s5] sm:$0xff] %v592_v50  ;;  %v287_v51 = vpack.c.bf16 %v592_v50, %v590_v36 }
 0x3ae   :  { %564 = vmatmul.mubr.bf16.vlgmr.msra.gmra.mrb[8].mxu0 %v287_v51 }
 0x481   :  { %v565_v53 = vpop.f32.mrb[8].mxu0 }
 0x482   :  { %v386_v54 = vadd.f32 %v565_v53, %v412_v52  ;;  %v377_v55 = vpop.f32.mrb[9].mxu0 }
 0x483   :  { %v378_v56 = vadd.f32 %v412_v52, %v377_v55  ;;  %v566_v57 = vpop.f32.mrb[10].mxu0 }
 0x484   :  { %394 = vst [vmem:[%s775_s4 + $0x10] sm:$0xff] %v386_v54  ;;  %v389_v58 = vadd.f32 %v566_v57, %v412_v52  ;;  %v380_v59 = vpop.f32.mrb[11].mxu0 }
 0x485   :  { %392 = vst [vmem:[%s775_s4] sm:$0xff] %v378_v56  ;;  %v381_v60 = vadd.f32 %v412_v52, %v380_v59 }
 0x486   :  { %395 = vst [vmem:[%s775_s4 + $0x18] sm:$0xff] %v389_v58 }
 0x487   :  { %393 = vst [vmem:[%s775_s4 + $0x8] sm:$0xff] %v381_v60 }

</bundles_post_ra>
